<compile_context>
chip_gen: v7x
topology: tpu7x:2x2x1
jax: 0.10.0
libtpu: 0.0.40
codegen_flags: <defaults>
</compile_context>

<pallas_src>
import jax
import jax.numpy as jnp
from jax.experimental import pallas as pl
from jax.experimental.pallas import tpu as pltpu

HIDDEN = 256  # fixed by the module (Linear1: seq_len -> 256)


def _round_up(a, b):
    return ((a + b - 1) // b) * b


def _mish(h):
    # Mish(x) = x * tanh(softplus(x)) = x * u / (u + 2), with u = e^x * (e^x + 2).
    # Single EUP transcendental (exp) + approx reciprocal.
    t = jnp.exp(jnp.minimum(h, 20.0))       # clamp mirrors torch softplus threshold
    u = t * (t + 2.0)
    return h * u * pl.reciprocal(u + 2.0, approx=True)


def _make_kernel(last_col):
    """last_col: static index of the original last time step inside the lane-padded x."""

    def kernel(x_ref, w1_ref, b1_ref, w2_ref, b2_ref, w2fc_ref, bf_ref, cs_ref, o_ref):
        x = x_ref[...]                                   # (TM, L_pad) f32
        seq_last = x[:, last_col:last_col + 1]           # (TM, 1)  f32, exact residual

        w1 = w1_ref[...]                                 # (L_pad, 256) bf16 (zero rows in pad)
        b1 = b1_ref[...]                                 # (1, 256)     f32
        w2 = w2_ref[...]                                 # (256, L_pad) bf16 (zero cols in pad)
        b2 = b2_ref[...]                                 # (1, L_pad)   f32
        w2fc = w2fc_ref[...]                             # (256, P_pad) bf16  = w2 @ wfc
        b_fuse = bf_ref[...]                             # (1, P_pad)   f32   = b2 @ wfc + bfc
        col_sum = cs_ref[...]                            # (1, P_pad)   f32   = sum_rows(wfc)

        def hidden(z):
            # bf16 MXU operands, f32 accumulation
            h = jnp.dot(z.astype(jnp.bfloat16), w1,
                        preferred_element_type=jnp.float32) + b1
            return _mish(h)

        h1 = hidden(x - seq_last)                        # (TM, 256)
        y1 = jnp.dot(h1.astype(jnp.bfloat16), w2,
                     preferred_element_type=jnp.float32) + b2     # (TM, L_pad)
        # The "+ seq_last" then "- seq_last" between the two blocks cancels exactly.
        h2 = hidden(y1)                                  # (TM, 256)
        # fc folded into Linear2 of block 2:
        #   (h2 @ w2 + b2 + seq_last) @ wfc + bfc
        # = h2 @ (w2 @ wfc) + (b2 @ wfc + bfc) + seq_last * sum_rows(wfc)
        out = (jnp.dot(h2.astype(jnp.bfloat16), w2fc,
                       preferred_element_type=jnp.float32)
               + b_fuse + seq_last * col_sum)            # (TM, P_pad)
        o_ref[...] = out.astype(o_ref.dtype)

    return kernel


def _vmem_capacity_bytes():
    try:
        return int(pltpu.get_tpu_info().vmem_capacity_bytes)
    except Exception:
        return 64 * 1024 * 1024   # conservative default (v7x-sized / non-TPU backends)


def _pick_row_tile(m_rows, L_pad, P_pad, budget_bytes):
    """Largest row tile whose double-buffered operands + f32 temporaries fit the budget."""
    w_bytes = 2 * ((L_pad * HIDDEN + HIDDEN * L_pad + HIDDEN * P_pad) * 2   # bf16 weights x2 buf
                   + (HIDDEN + L_pad + 2 * P_pad) * 4)                       # f32 biases   x2 buf
    kmax = max(HIDDEN, L_pad, P_pad)
    for tm in (2048, 1024, 512, 256, 128, 64, 32, 16, 8):
        if tm > m_rows:
            continue
        x_bytes = 2 * tm * L_pad * 4            # f32 row tile, double-buffered
        o_bytes = 2 * tm * P_pad * 4            # f32 output tile, double-buffered
        tmp_bytes = 8 * tm * kmax * 4           # live f32/bf16 intermediates headroom
        if w_bytes + x_bytes + o_bytes + tmp_bytes <= budget_bytes:
            return tm
    return 8


def nlinear_forward(x, params):
    """x: (B, seq_len, C) float32 -> (B, pred_len, C) float32, matching NLinear.forward."""
    w1, b1, w2, b2, wfc, bfc = params
    B, L, C = x.shape
    P = wfc.shape[1]

    L_pad = max(128, _round_up(L, 128))
    P_pad = max(128, _round_up(P, 128))

    # --- fold fc into the tail of block 2 (wrapper side, f32) ---
    w2fc = w2 @ wfc                                       # (256, P)
    b_fuse = b2 @ wfc + bfc                               # (1, P)
    col_sum = jnp.sum(wfc, axis=0, keepdims=True)         # (1, P)  (original L rows only)

    # --- zero-pad lane dims (mathematically exact) ---
    w1_p = jnp.pad(w1, ((0, L_pad - L), (0, 0))).astype(jnp.bfloat16)     # (L_pad, 256)
    w2_p = jnp.pad(w2, ((0, 0), (0, L_pad - L))).astype(jnp.bfloat16)     # (256, L_pad)
    b2_p = jnp.pad(b2, ((0, 0), (0, L_pad - L)))                          # (1, L_pad)
    w2fc_p = jnp.pad(w2fc, ((0, 0), (0, P_pad - P))).astype(jnp.bfloat16) # (256, P_pad)
    b_fuse_p = jnp.pad(b_fuse, ((0, 0), (0, P_pad - P)))                  # (1, P_pad)
    col_sum_p = jnp.pad(col_sum, ((0, 0), (0, P_pad - P)))                # (1, P_pad)

    # (B, L, C) -> (B, C, L) -> (B*C, L_pad), kept in f32 (exact seq_last residual)
    x_rows = jnp.transpose(x, (0, 2, 1)).reshape(B * C, L)
    x_rows = jnp.pad(x_rows, ((0, 0), (0, L_pad - L)))

    M = B * C
    M8 = _round_up(M, 8)

    # --- generation-aware VMEM budgeting ---
    cap = _vmem_capacity_bytes()
    if cap <= 80 * 1024 * 1024:        # v7x-class: 64 MiB VMEM per TensorCore
        budget, vmem_limit = 24 * 1024 * 1024, 40 * 1024 * 1024
    else:                               # v5e / v6e: 128 MiB VMEM
        budget, vmem_limit = 80 * 1024 * 1024, 96 * 1024 * 1024

    TM = _pick_row_tile(M8, L_pad, P_pad, budget)
    # megacore: keep >= 4 grid steps (>= 2 per TensorCore on v7x) when there is enough work
    while TM > 128 and pl.cdiv(M8, TM) < 4:
        TM //= 2
    # rebalance the tile so zero-row padding waste stays small
    nsteps = pl.cdiv(M8, TM)
    TM = _round_up(pl.cdiv(M8, nsteps), 8)
    M_pad = nsteps * TM

    if M_pad != M:
        x_rows = jnp.pad(x_rows, ((0, M_pad - M), (0, 0)))

    full = lambda i: (0, 0)
    rows = lambda i: (i, 0)

    out_rows = pl.pallas_call(
        _make_kernel(L - 1),
        out_shape=jax.ShapeDtypeStruct((M_pad, P_pad), jnp.float32),
        grid_spec=pltpu.PrefetchScalarGridSpec(
            num_scalar_prefetch=0,
            grid=(nsteps,),
            in_specs=[
                pl.BlockSpec((TM, L_pad), rows),        # x rows (f32, lane-padded)
                pl.BlockSpec((L_pad, HIDDEN), full),    # w1 (bf16)
                pl.BlockSpec((1, HIDDEN), full),        # b1 (f32)
                pl.BlockSpec((HIDDEN, L_pad), full),    # w2 (bf16)
                pl.BlockSpec((1, L_pad), full),         # b2 (f32)
                pl.BlockSpec((HIDDEN, P_pad), full),    # w2 @ wfc (bf16)
                pl.BlockSpec((1, P_pad), full),         # b2 @ wfc + bfc (f32)
                pl.BlockSpec((1, P_pad), full),         # column sums of wfc (f32)
            ],
            out_specs=pl.BlockSpec((TM, P_pad), rows),
        ),
        compiler_params=pltpu.CompilerParams(
            dimension_semantics=("parallel",),
            vmem_limit_bytes=vmem_limit,
        ),
    )(x_rows, w1_p, b1, w2_p, b2_p, w2fc_p, b_fuse_p, col_sum_p)

    # (B*C, P) -> (B, C, P) -> (B, P, C)
    out = out_rows[:M, :P].reshape(B, C, P)
    return jnp.transpose(out, (0, 2, 1)).astype(x.dtype)


def init_params(key, seq_len, pred_len):
    """Deterministic synthetic parameters with nn.Linear-style uniform init.

    Stored already transposed for y = x @ W_t + b:
      w1: (seq_len, 256), b1: (1, 256)
      w2: (256, seq_len), b2: (1, seq_len)
      wfc: (seq_len, pred_len), bfc: (1, pred_len)
    """
    k = jax.random.split(key, 6)

    def lin(kw, kb, fan_in, fan_out):
        bound = 1.0 / jnp.sqrt(jnp.float32(fan_in))
        w = jax.random.uniform(kw, (fan_in, fan_out), jnp.float32, -bound, bound)
        b = jax.random.uniform(kb, (1, fan_out), jnp.float32, -bound, bound)
        return w, b

    w1, b1 = lin(k[0], k[1], seq_len, HIDDEN)
    w2, b2 = lin(k[2], k[3], HIDDEN, seq_len)
    wfc, bfc = lin(k[4], k[5], seq_len, pred_len)
    return (w1, b1, w2, b2, wfc, bfc)


def nlinear_reference(x, params):
    """Pure-JAX f32 reference mirroring the PyTorch forward op-for-op (no bf16 dots)."""
    w1, b1, w2, b2, wfc, bfc = params
    seq_last = x[:, -1:, :]                               # (B, 1, C)

    def lin(zp, w, b):                                    # zp: (B, C, K)
        return jnp.einsum('bck,kn->bcn', zp, w) + b

    def block(zp):                                        # zp: (B, C, L)
        h = lin(zp, w1, b1[0])
        h = h * jnp.tanh(jax.nn.softplus(h))
        return lin(h, w2, b2[0])                          # (B, C, L)

    xp = jnp.transpose(x - seq_last, (0, 2, 1))           # (B, C, L)
    y = jnp.transpose(block(xp), (0, 2, 1)) + seq_last    # (B, L, C)
    y = y - seq_last
    y2 = jnp.transpose(block(jnp.transpose(y, (0, 2, 1))), (0, 2, 1)) + seq_last
    outp = lin(jnp.transpose(y2, (0, 2, 1)), wfc, bfc[0]) # (B, C, P)
    return jnp.transpose(outp, (0, 2, 1))                 # (B, P, C)


if __name__ == "__main__":
    B, seq_len, pred_len, C = 2, 8, 4, 4

    key = jax.random.PRNGKey(0)
    kx, kp = jax.random.split(key)
    x = jax.random.normal(kx, (B, seq_len, C), jnp.float32)
    params = init_params(kp, seq_len, pred_len)

    out = jax.block_until_ready(nlinear_forward(x, params))
    assert out.shape == (B, pred_len, C), out.shape

    # Semantic check vs the pure-f32 op-for-op reference.  Tolerance covers the kernel's
    # bf16 MXU operands (f32 accumulation) and the wrapper-side w2@wfc re-association.
    ref = jax.block_until_ready(nlinear_reference(x, params))
    max_err = jnp.max(jnp.abs(out - ref))
    assert jnp.allclose(out, ref, atol=5e-2, rtol=5e-2), f"max abs err {max_err}"

    print("KERNEL_OK")
</pallas_src>

<mosaic_0001>
module attributes {stable_mosaic.version = 11 : i64} {
  func.func @kernel(%arg0: i32, %arg1: memref<8x128xf32, #tpu.memory_space<vmem>>, %arg2: memref<128x256xbf16, #tpu.memory_space<vmem>>, %arg3: memref<1x256xf32, #tpu.memory_space<vmem>>, %arg4: memref<256x128xbf16, #tpu.memory_space<vmem>>, %arg5: memref<1x128xf32, #tpu.memory_space<vmem>>, %arg6: memref<256x128xbf16, #tpu.memory_space<vmem>>, %arg7: memref<1x128xf32, #tpu.memory_space<vmem>>, %arg8: memref<1x128xf32, #tpu.memory_space<vmem>>, %arg9: memref<8x128xf32, #tpu.memory_space<vmem>>) attributes {dimension_semantics = [#tpu.dimension_semantics<parallel>], iteration_bounds = array<i64: 1>, scalar_prefetch = 0 : i64, scratch_operands = 0 : i64, tpu.core_type = #tpu.core_type<tc>, window_params = [{transform_indices = @transform_0, window_bounds = array<i64: 8, 128>}, {pipeline_mode = #tpu.pipeline_mode<synchronous>, transform_indices = @transform_1, window_bounds = array<i64: 128, 256>}, {pipeline_mode = #tpu.pipeline_mode<synchronous>, transform_indices = @transform_2, window_bounds = array<i64: 1, 256>}, {pipeline_mode = #tpu.pipeline_mode<synchronous>, transform_indices = @transform_3, window_bounds = array<i64: 256, 128>}, {pipeline_mode = #tpu.pipeline_mode<synchronous>, transform_indices = @transform_4, window_bounds = array<i64: 1, 128>}, {pipeline_mode = #tpu.pipeline_mode<synchronous>, transform_indices = @transform_5, window_bounds = array<i64: 256, 128>}, {pipeline_mode = #tpu.pipeline_mode<synchronous>, transform_indices = @transform_6, window_bounds = array<i64: 1, 128>}, {pipeline_mode = #tpu.pipeline_mode<synchronous>, transform_indices = @transform_7, window_bounds = array<i64: 1, 128>}, {transform_indices = @transform_8, window_bounds = array<i64: 8, 128>}]} {
    %c0 = arith.constant 0 : index
    %c0_0 = arith.constant 0 : index
    %0 = vector.load %arg1[%c0, %c0_0] : memref<8x128xf32, #tpu.memory_space<vmem>>, vector<8x128xf32>
    %1 = vector.extract_strided_slice %0 {offsets = [0, 7], sizes = [8, 1], strides = [1, 1]} : vector<8x128xf32> to vector<8x1xf32>
    %c0_1 = arith.constant 0 : index
    %c0_2 = arith.constant 0 : index
    %2 = vector.load %arg2[%c0_1, %c0_2] : memref<128x256xbf16, #tpu.memory_space<vmem>>, vector<128x256xbf16>
    %c0_3 = arith.constant 0 : index
    %c0_4 = arith.constant 0 : index
    %3 = vector.load %arg3[%c0_3, %c0_4] : memref<1x256xf32, #tpu.memory_space<vmem>>, vector<1x256xf32>
    %c0_5 = arith.constant 0 : index
    %c0_6 = arith.constant 0 : index
    %4 = vector.load %arg4[%c0_5, %c0_6] : memref<256x128xbf16, #tpu.memory_space<vmem>>, vector<256x128xbf16>
    %c0_7 = arith.constant 0 : index
    %c0_8 = arith.constant 0 : index
    %5 = vector.load %arg5[%c0_7, %c0_8] : memref<1x128xf32, #tpu.memory_space<vmem>>, vector<1x128xf32>
    %c0_9 = arith.constant 0 : index
    %c0_10 = arith.constant 0 : index
    %6 = vector.load %arg6[%c0_9, %c0_10] : memref<256x128xbf16, #tpu.memory_space<vmem>>, vector<256x128xbf16>
    %c0_11 = arith.constant 0 : index
    %c0_12 = arith.constant 0 : index
    %7 = vector.load %arg7[%c0_11, %c0_12] : memref<1x128xf32, #tpu.memory_space<vmem>>, vector<1x128xf32>
    %c0_13 = arith.constant 0 : index
    %c0_14 = arith.constant 0 : index
    %8 = vector.load %arg8[%c0_13, %c0_14] : memref<1x128xf32, #tpu.memory_space<vmem>>, vector<1x128xf32>
    %9 = vector.broadcast %1 : vector<8x1xf32> to vector<8x128xf32>
    %10 = arith.subf %0, %9 : vector<8x128xf32>
    %11 = arith.truncf %10 : vector<8x128xf32> to vector<8x128xbf16>
    %cst = arith.constant dense<0.000000e+00> : vector<8x256xf32>
    %12 = tpu.matmul %11, %2, %cst {dimension_numbers = #tpu.dot_dimension_numbers<[1], [0], [0], [1], [0, 0, 1, 1], [], []>} : vector<8x128xbf16>, vector<128x256xbf16>, vector<8x256xf32> -> vector<8x256xf32>
    %13 = vector.broadcast %3 : vector<1x256xf32> to vector<8x256xf32>
    %14 = arith.addf %12, %13 : vector<8x256xf32>
    %cst_15 = arith.constant 2.000000e+01 : f32
    %15 = vector.broadcast %cst_15 : f32 to vector<8x256xf32>
    %16 = arith.minimumf %14, %15 : vector<8x256xf32>
    %17 = math.exp %16 : vector<8x256xf32>
    %cst_16 = arith.constant 2.000000e+00 : f32
    %18 = vector.broadcast %cst_16 : f32 to vector<8x256xf32>
    %19 = arith.addf %17, %18 : vector<8x256xf32>
    %20 = arith.mulf %17, %19 : vector<8x256xf32>
    %21 = arith.mulf %14, %20 : vector<8x256xf32>
    %cst_17 = arith.constant 2.000000e+00 : f32
    %22 = vector.broadcast %cst_17 : f32 to vector<8x256xf32>
    %23 = arith.addf %20, %22 : vector<8x256xf32>
    %24 = tpu.reciprocal %23 {approx = true} : vector<8x256xf32> -> vector<8x256xf32>
    %25 = arith.mulf %21, %24 : vector<8x256xf32>
    %26 = arith.truncf %25 : vector<8x256xf32> to vector<8x256xbf16>
    %cst_18 = arith.constant dense<0.000000e+00> : vector<8x128xf32>
    %27 = tpu.matmul %26, %4, %cst_18 {dimension_numbers = #tpu.dot_dimension_numbers<[1], [0], [0], [1], [0, 0, 1, 1], [], []>} : vector<8x256xbf16>, vector<256x128xbf16>, vector<8x128xf32> -> vector<8x128xf32>
    %28 = vector.broadcast %5 : vector<1x128xf32> to vector<8x128xf32>
    %29 = arith.addf %27, %28 : vector<8x128xf32>
    %30 = arith.truncf %29 : vector<8x128xf32> to vector<8x128xbf16>
    %cst_19 = arith.constant dense<0.000000e+00> : vector<8x256xf32>
    %31 = tpu.matmul %30, %2, %cst_19 {dimension_numbers = #tpu.dot_dimension_numbers<[1], [0], [0], [1], [0, 0, 1, 1], [], []>} : vector<8x128xbf16>, vector<128x256xbf16>, vector<8x256xf32> -> vector<8x256xf32>
    %32 = vector.broadcast %3 : vector<1x256xf32> to vector<8x256xf32>
    %33 = arith.addf %31, %32 : vector<8x256xf32>
    %cst_20 = arith.constant 2.000000e+01 : f32
    %34 = vector.broadcast %cst_20 : f32 to vector<8x256xf32>
    %35 = arith.minimumf %33, %34 : vector<8x256xf32>
    %36 = math.exp %35 : vector<8x256xf32>
    %cst_21 = arith.constant 2.000000e+00 : f32
    %37 = vector.broadcast %cst_21 : f32 to vector<8x256xf32>
    %38 = arith.addf %36, %37 : vector<8x256xf32>
    %39 = arith.mulf %36, %38 : vector<8x256xf32>
    %40 = arith.mulf %33, %39 : vector<8x256xf32>
    %cst_22 = arith.constant 2.000000e+00 : f32
    %41 = vector.broadcast %cst_22 : f32 to vector<8x256xf32>
    %42 = arith.addf %39, %41 : vector<8x256xf32>
    %43 = tpu.reciprocal %42 {approx = true} : vector<8x256xf32> -> vector<8x256xf32>
    %44 = arith.mulf %40, %43 : vector<8x256xf32>
    %45 = arith.truncf %44 : vector<8x256xf32> to vector<8x256xbf16>
    %cst_23 = arith.constant dense<0.000000e+00> : vector<8x128xf32>
    %46 = tpu.matmul %45, %6, %cst_23 {dimension_numbers = #tpu.dot_dimension_numbers<[1], [0], [0], [1], [0, 0, 1, 1], [], []>} : vector<8x256xbf16>, vector<256x128xbf16>, vector<8x128xf32> -> vector<8x128xf32>
    %47 = vector.broadcast %7 : vector<1x128xf32> to vector<8x128xf32>
    %48 = arith.addf %46, %47 : vector<8x128xf32>
    %49 = vector.broadcast %1 : vector<8x1xf32> to vector<8x128xf32>
    %50 = vector.broadcast %8 : vector<1x128xf32> to vector<8x128xf32>
    %51 = arith.mulf %49, %50 : vector<8x128xf32>
    %52 = arith.addf %48, %51 : vector<8x128xf32>
    %c0_24 = arith.constant 0 : index
    %c0_25 = arith.constant 0 : index
    %53 = vector.load %arg9[%c0_24, %c0_25] : memref<8x128xf32, #tpu.memory_space<vmem>>, vector<8x128xf32>
    tpu.vector_store %arg9[%c0_24, %c0_25], %52 {strides = array<i32>} : memref<8x128xf32, #tpu.memory_space<vmem>>, vector<8x128xf32>,
    return
  }
  func.func @transform_0(%arg0: i32) -> (i32, i32) {
    %c0_i32 = arith.constant 0 : i32
    %c0_i32_0 = arith.constant 0 : i32
    return %arg0, %c0_i32 : i32, i32
  }
  func.func @transform_1(%arg0: i32) -> (i32, i32) {
    %c0_i32 = arith.constant 0 : i32
    %c0_i32_0 = arith.constant 0 : i32
    %c0_i32_1 = arith.constant 0 : i32
    return %c0_i32, %c0_i32_0 : i32, i32
  }
  func.func @transform_2(%arg0: i32) -> (i32, i32) {
    %c0_i32 = arith.constant 0 : i32
    %c0_i32_0 = arith.constant 0 : i32
    %c0_i32_1 = arith.constant 0 : i32
    return %c0_i32, %c0_i32_0 : i32, i32
  }
  func.func @transform_3(%arg0: i32) -> (i32, i32) {
    %c0_i32 = arith.constant 0 : i32
    %c0_i32_0 = arith.constant 0 : i32
    %c0_i32_1 = arith.constant 0 : i32
    return %c0_i32, %c0_i32_0 : i32, i32
  }
  func.func @transform_4(%arg0: i32) -> (i32, i32) {
    %c0_i32 = arith.constant 0 : i32
    %c0_i32_0 = arith.constant 0 : i32
    %c0_i32_1 = arith.constant 0 : i32
    return %c0_i32, %c0_i32_0 : i32, i32
  }
  func.func @transform_5(%arg0: i32) -> (i32, i32) {
    %c0_i32 = arith.constant 0 : i32
    %c0_i32_0 = arith.constant 0 : i32
    %c0_i32_1 = arith.constant 0 : i32
    return %c0_i32, %c0_i32_0 : i32, i32
  }
  func.func @transform_6(%arg0: i32) -> (i32, i32) {
    %c0_i32 = arith.constant 0 : i32
    %c0_i32_0 = arith.constant 0 : i32
    %c0_i32_1 = arith.constant 0 : i32
    return %c0_i32, %c0_i32_0 : i32, i32
  }
  func.func @transform_7(%arg0: i32) -> (i32, i32) {
    %c0_i32 = arith.constant 0 : i32
    %c0_i32_0 = arith.constant 0 : i32
    %c0_i32_1 = arith.constant 0 : i32
    return %c0_i32, %c0_i32_0 : i32, i32
  }
  func.func @transform_8(%arg0: i32) -> (i32, i32) {
    %c0_i32 = arith.constant 0 : i32
    %c0_i32_0 = arith.constant 0 : i32
    return %arg0, %c0_i32 : i32, i32
  }
}

</mosaic_0001>

<bundles_post_ra>
// kernel: tpu_custom_call.1
= control target key start
LH: loop header
LB: loop body
LE: loop exit
PB: predicated region body
PF: predicated region fallthrough
CT: control target
= control target key end

     0   :  { %13 = vsyncpa [#allocation3], 0  ;;  %s1137_s0 = inlined_call_operand.hbm [shape: f32[8,128], index: 0, kind: input, shape index: {}]   ;;  %s1138_s1 = inlined_call_operand.hbm [shape: bf16[128,256], index: 1, kind: input, shape index: {}]   ;;  %s1139_s2 = inlined_call_operand.vmem [shape: f32[1,256], index: 2, kind: input, shape index: {}]   ;;  %s1140_s3 = inlined_call_operand.hbm [shape: bf16[256,128], index: 3, kind: input, shape index: {}]   ;;  %s1141_s4 = inlined_call_operand.vmem [shape: f32[1,128], index: 4, kind: input, shape index: {}]   ;;  %s1142_s5 = inlined_call_operand.hbm [shape: bf16[256,128], index: 5, kind: input, shape index: {}]   ;;  %s1143_s6 = inlined_call_operand.vmem [shape: f32[1,128], index: 6, kind: input, shape index: {}]   ;;  %s1144_s7 = inlined_call_operand.vmem [shape: f32[1,128], index: 7, kind: input, shape index: {}]   ;;  %s1145_s8 = inlined_call_operand.hbm [shape: f32[8,128], index: 8, kind: output, shape index: {}]  }
   0x1   :  { %14 = vsyncpa [#allocation6], 0 }
   0x2   :  { %15 = vsyncpa [#allocation9], 0 }
   0x3   :  { %16 = vsyncpa [#allocation4], 0  ;;  %s997_s27 = smov [#allocation5]   ;;  %s879_s9 = scalar_lea.hbm %s1138_s1, 2048 }
   0x4   :  { %s32_s28 = sshll.u32 %s997_s27, 4  ;;  %p880_p0 = scmp.ne.s32.totalorder %s1138_s1, %s879_s9  ;;  %s33_s28 = int_to_ptr.vmem [resolvable:$true] %s32_s28 }
   0x5   :  { %p883_p1 = scmp.lt.u32.totalorder %s879_s9, %s1138_s1 }
   0x7   :  { %p885_p2 = pnand %p883_p1, %p880_p0 }
   0x9   :  { %888 = shalt.err (!%p885_p2)
}
   0xa   :  { %s889_s14 = scalar_lea.vmem %s33_s28, 2048  ;;  %p894_p4 = scmp.lt.s32.totalorder %s33_s28, %s33_s28 }
   0xb   :  { %p890_p3 = scmp.ne.s32.totalorder %s33_s28, %s889_s14  ;;  %p895_p5 = scmp.lt.s32.totalorder %s889_s14, %s889_s14 }
   0xd   :  { %p896_p6 = por %p895_p5, %p894_p4 }
   0xf   :  { %p897_p7 = pnand %p896_p6, %p890_p3 }
  0x11   :  { %900 = shalt.err (!%p897_p7)
}
  0x12   :  { %s998_s15 = smov 128   ;;  %s999_s16 = smov 8  }
  0x13   :  { %38 = dma.hbm_to_vmem [thread:$0]  %s1138_s1, 2048, %s33_s28, [#allocation6], %s998_s15, %s998_s15, %s999_s16  }
  0x14   :  { %s1000_s19 = smov [#allocation2]   ;;  %s1001_s21 = smov [#allocation7]  }
  0x15   :  { %s23_s20 = sshll.u32 %s1000_s19, 4  ;;  %s46_s22 = sshll.u32 %s1001_s21, 4  ;;  %s24_s20 = int_to_ptr.vmem [resolvable:$true] %s23_s20  ;;  %s47_s22 = int_to_ptr.vmem [resolvable:$true] %s46_s22 }
  0x16   :  { %s901_s25 = scalar_lea.hbm %s1137_s0, 128 }
  0x17   :  { %p902_p8 = scmp.ne.s32.totalorder %s1137_s0, %s901_s25  ;;  %p905_p9 = scmp.lt.u32.totalorder %s901_s25, %s1137_s0 }
  0x19   :  { %p907_p10 = pnand %p905_p9, %p902_p8 }
  0x1b   :  { %910 = shalt.err (!%p907_p10)
}
  0x1c   :  { %s911_s1 = scalar_lea.vmem %s24_s20, 128  ;;  %p916_p12 = scmp.lt.s32.totalorder %s24_s20, %s24_s20 }
  0x1d   :  { %p912_p11 = scmp.ne.s32.totalorder %s24_s20, %s911_s1  ;;  %p917_p13 = scmp.lt.s32.totalorder %s911_s1, %s911_s1 }
  0x1f   :  { %p918_p0 = por %p917_p13, %p916_p12 }
  0x21   :  { %p919_p1 = pnand %p918_p0, %p912_p11 }
  0x23   :  { %922 = shalt.err (!%p919_p1)
}
  0x24   :  { %26 = dma.hbm_to_vmem [thread:$0]  %s1137_s0, 128, %s24_s20, [#allocation3]  }
  0x25   :  { %s923_s12 = scalar_lea.hbm %s1140_s3, 2048 }
  0x26   :  { %p924_p2 = scmp.ne.s32.totalorder %s1140_s3, %s923_s12  ;;  %p927_p3 = scmp.lt.u32.totalorder %s923_s12, %s1140_s3 }
  0x28   :  { %p929_p4 = pnand %p927_p3, %p924_p2 }
  0x2a   :  { %932 = shalt.err (!%p929_p4)
}
  0x2b   :  { %s933_s17 = scalar_lea.vmem %s47_s22, 2048  ;;  %p938_p6 = scmp.lt.s32.totalorder %s47_s22, %s47_s22 }
  0x2c   :  { %p934_p5 = scmp.ne.s32.totalorder %s47_s22, %s933_s17  ;;  %p939_p7 = scmp.lt.s32.totalorder %s933_s17, %s933_s17 }
  0x2e   :  { %p940_p8 = por %p939_p7, %p938_p6 }
  0x30   :  { %p941_p9 = pnand %p940_p8, %p934_p5 }
  0x32   :  { %944 = shalt.err (!%p941_p9)
}
  0x33   :  { %s1002_s0 = smov 64   ;;  %s1003_s18 = smov 4  }
  0x34   :  { %52 = dma.hbm_to_vmem [thread:$0]  %s1140_s3, 2048, %s47_s22, [#allocation6], %s1002_s0, %s1002_s0, %s1003_s18  }
  0x35   :  { %s1004_s21 = smov [#allocation8]   ;;  %s945_s26 = scalar_lea.hbm %s1142_s5, 2048 }
  0x36   :  { %s60_s23 = sshll.u32 %s1004_s21, 4  ;;  %p946_p10 = scmp.ne.s32.totalorder %s1142_s5, %s945_s26  ;;  %s61_s23 = int_to_ptr.vmem [resolvable:$true] %s60_s23 }
  0x37   :  { %p949_p11 = scmp.lt.u32.totalorder %s945_s26, %s1142_s5 }
  0x39   :  { %p951_p12 = pnand %p949_p11, %p946_p10 }
  0x3b   :  { %954 = shalt.err (!%p951_p12)
}
  0x3c   :  { %s955_s28 = scalar_lea.vmem %s61_s23, 2048  ;;  %p960_p0 = scmp.lt.s32.totalorder %s61_s23, %s61_s23 }
  0x3d   :  { %p956_p13 = scmp.ne.s32.totalorder %s61_s23, %s955_s28  ;;  %p961_p1 = scmp.lt.s32.totalorder %s955_s28, %s955_s28 }
  0x3f   :  { %p962_p2 = por %p961_p1, %p960_p0 }
  0x41   :  { %p963_p3 = pnand %p962_p2, %p956_p13 }
  0x43   :  { %966 = shalt.err (!%p963_p3)
}
  0x44   :  { %66 = dma.hbm_to_vmem [thread:$0]  %s1142_s5, 2048, %s61_s23, [#allocation9], %s1002_s0, %s1002_s0, %s1003_s18  }
  0x45   :  { %989 = dma.done.wait [#allocation3], 128  }
  0x46   :  { %990 = vsyncadd [#allocation3], 4294967168 }
  0x47   :  { %991 = dma.done.wait [#allocation6], 4096  }
  0x48   :  { %992 = vsyncadd [#allocation6], 4294963200 }
  0x49   :  { %993 = dma.done.wait [#allocation9], 2048  }
  0x4a   :  { %994 = vsyncadd [#allocation9], 4294965248  ;;  %v1005_v0 = vmov 7   ;;  %v84_v1 = vld [vmem:[#allocation2] sm:$0xff]  ;;  %v807_v2 = vld [vmem:[#allocation5 + $0x4] ss:$8 sps:$4 sm:$0xff]   ;;  %v177_v38 = vlaneseq }
  0x4b   :  { %806 = vset.pattern.permute.xlu0 %v1005_v0  ;;  %v809_v3 = vld [vmem:[#allocation5] ss:$8 sps:$4 sm:$0xff]   ;;  %v810_v4 = vld [vmem:[#allocation5 + $0x14] ss:$8 sps:$4 sm:$0xff]   ;;  %267 = vmatprep.subr.bf16.mxu0 %v807_v2  ;;  %v812_v5 = vld [vmem:[#allocation5 + $0x10] ss:$8 sps:$4 sm:$0xff]  }
  0x4c   :  { %171 = vperm.xlu0 %806, %v84_v1   ;;  %268 = vmatpush1.bf16.msra.mxu0 %v809_v3  ;;  %v1006_v6 = vmov 0   ;;  %v813_v7 = vld [vmem:[#allocation5 + $0x24] ss:$8 sps:$4 sm:$0xff]   ;;  %v815_v8 = vld [vmem:[#allocation5 + $0x20] ss:$8 sps:$4 sm:$0xff]   ;;  %v835_v26 = vld [vmem:[#allocation7 + $0x50] sm:$0xff]  }
  0x4d   :  { %299 = vmatprep.mubr.bf16.mxu0 %v1006_v6  ;;  %269 = vmatprep.subr.bf16.mxu0 %v810_v4  ;;  %v816_v9 = vld [vmem:[#allocation5 + $0x34] ss:$8 sps:$4 sm:$0xff]   ;;  %v818_v10 = vld [vmem:[#allocation5 + $0x30] ss:$8 sps:$4 sm:$0xff]   ;;  %v819_v11 = vld [vmem:[#allocation5 + $0x44] ss:$8 sps:$4 sm:$0xff]  }
  0x4e   :  { %v821_v12 = vld [vmem:[#allocation5 + $0x40] ss:$8 sps:$4 sm:$0xff]   ;;  %v822_v13 = vld [vmem:[#allocation5 + $0x54] ss:$8 sps:$4 sm:$0xff]   ;;  %v824_v14 = vld [vmem:[#allocation5 + $0x50] ss:$8 sps:$4 sm:$0xff]  }
  0x4f   :  { %v825_v15 = vld [vmem:[#allocation5 + $0x64] ss:$8 sps:$4 sm:$0xff]   ;;  %v827_v16 = vld [vmem:[#allocation5 + $0x60] ss:$8 sps:$4 sm:$0xff]   ;;  %v828_v17 = vld [vmem:[#allocation5 + $0x74] ss:$8 sps:$4 sm:$0xff]  }
  0x50   :  { %270 = vmatpush1.bf16.msra.mxu0 %v812_v5  ;;  %v830_v18 = vld [vmem:[#allocation5 + $0x70] ss:$8 sps:$4 sm:$0xff]   ;;  %v831_v22 = vld [vmem:[#allocation7 + $0x40] sm:$0xff]   ;;  %v833_v24 = vld [vmem:[#allocation7 + $0x48] sm:$0xff]   ;;  %v178_v39 = vshrl.u32 %v177_v38, 7  ;;  %s1007_s14 = smov [#allocation10]  }
  0x51   :  { %271 = vmatprep.subr.bf16.mxu0 %v813_v7  ;;  %v832_v23 = vld [vmem:[#allocation7] sm:$0xff]   ;;  %751 = vmatprep.subr.bf16.mxu1 %v831_v22  ;;  %v834_v25 = vld [vmem:[#allocation7 + $0x8] sm:$0xff]   ;;  %v836_v27 = vld [vmem:[#allocation7 + $0x10] sm:$0xff]   ;;  %s689_s15 = sshll.u32 %s1007_s14, 4  ;;  %s690_s15 = int_to_ptr.vmem [resolvable:$true] %s689_s15 }
  0x52   :  { %752 = vmatpush3.bf16.msra.mxu1 %v832_v23  ;;  %v837_v28 = vld [vmem:[#allocation7 + $0x58] sm:$0xff]   ;;  %v839_v30 = vld [vmem:[#allocation7 + $0x60] sm:$0xff]   ;;  %v841_v32 = vld [vmem:[#allocation7 + $0x68] sm:$0xff]   ;;  %v179_v40 = vsub.s32 0, %v178_v39  ;;  %v183_v42 = vsub.s32 1, %v178_v39  ;;  %s967_s16 = scalar_lea.vmem %s690_s15, 128  ;;  %p972_p5 = scmp.lt.s32.totalorder %s690_s15, %s690_s15 }
  0x53   :  { %753 = vmatprep.subr.bf16.mxu1 %v833_v24  ;;  %v838_v29 = vld [vmem:[#allocation7 + $0x18] sm:$0xff]   ;;  %v840_v31 = vld [vmem:[#allocation7 + $0x20] sm:$0xff]   ;;  %v842_v33 = vld [vmem:[#allocation7 + $0x28] sm:$0xff]   ;;  %p968_p4 = scmp.ne.s32.totalorder %s690_s15, %s967_s16  ;;  %p973_p6 = scmp.lt.s32.totalorder %s967_s16, %s967_s16 }
  0x54   :  { %272 = vmatpush1.bf16.msra.mxu0 %v815_v8  ;;  %v843_v34 = vld [vmem:[#allocation7 + $0x70] sm:$0xff]   ;;  %v845_v36 = vld [vmem:[#allocation7 + $0x78] sm:$0xff]   ;;  %v855_v24 = vld [vmem:[#allocation8 + $0x60] sm:$0xff]  }
  0x55   :  { %273 = vmatprep.subr.bf16.mxu0 %v816_v9  ;;  %v844_v35 = vld [vmem:[#allocation7 + $0x30] sm:$0xff]   ;;  %v846_v37 = vld [vmem:[#allocation7 + $0x38] sm:$0xff]   ;;  %p974_p7 = por %p973_p6, %p972_p5 }
  0x56   :  { %754 = vmatpush3.bf16.msra.mxu1 %v834_v25  ;;  %v101_v41 = vld [vmem:[%s1139_s2] sm:$0x3]  ;;  %v856_v25 = vld [vmem:[#allocation8 + $0x20] sm:$0xff]  }
  0x57   :  { %755 = vmatprep.subr.bf16.mxu1 %v835_v26  ;;  %v1107_v43 = vrot.slane %v101_v41, %v179_v40  ;;  %v1109_v44 = vrot.slane %v101_v41, %v183_v42  ;;  %v853_v22 = vld [vmem:[#allocation8 + $0x58] sm:$0xff]   ;;  %v857_v26 = vld [vmem:[#allocation8 + $0x68] sm:$0xff]   ;;  %p975_p8 = pnand %p974_p7, %p968_p4 }
  0x58   :  { %274 = vmatpush1.bf16.msra.mxu0 %v818_v10  ;;  %v854_v23 = vld [vmem:[#allocation8 + $0x18] sm:$0xff]  }
  0x59   :  { %275 = vmatprep.subr.bf16.mxu0 %v819_v11 }
  0x5a   :  { %756 = vmatpush3.bf16.msra.mxu1 %v836_v27  ;;  %v858_v27 = vld [vmem:[#allocation8 + $0x28] sm:$0xff]  }
  0x5b   :  { %757 = vmatprep.subr.bf16.mxu1 %v837_v28  ;;  %v859_v28 = vld [vmem:[#allocation8 + $0x70] sm:$0xff]  }
  0x5c   :  { %276 = vmatpush1.bf16.msra.mxu0 %v821_v12 }
  0x5d   :  { %277 = vmatprep.subr.bf16.mxu0 %v822_v13 }
  0x5e   :  { %758 = vmatpush3.bf16.msra.mxu1 %v838_v29  ;;  %v860_v29 = vld [vmem:[#allocation8 + $0x30] sm:$0xff]  }
  0x5f   :  { %759 = vmatprep.subr.bf16.mxu1 %v839_v30  ;;  %v861_v30 = vld [vmem:[#allocation8 + $0x78] sm:$0xff]  }
  0x60   :  { %278 = vmatpush1.bf16.msra.mxu0 %v824_v14 }
  0x61   :  { %279 = vmatprep.subr.bf16.mxu0 %v825_v15 }
  0x62   :  { %760 = vmatpush3.bf16.msra.mxu1 %v840_v31  ;;  %v862_v31 = vld [vmem:[#allocation8 + $0x38] sm:$0xff]  }
  0x63   :  { %761 = vmatprep.subr.bf16.mxu1 %v841_v32 }
  0x64   :  { %280 = vmatpush1.bf16.msra.mxu0 %v827_v16 }
  0x65   :  { %281 = vmatprep.subr.bf16.mxu0 %v828_v17 }
  0x66   :  { %762 = vmatpush3.bf16.msra.mxu1 %v842_v33 }
  0x67   :  { %763 = vmatprep.subr.bf16.mxu1 %v843_v34 }
  0x68   :  { %282 = vmatpush1.bf16.msra.mxu0 %v830_v18 }
  0x69   :  { %471 = vmatprep.subr.bf16.mxu0 %v807_v2 }
  0x6a   :  { %764 = vmatpush3.bf16.msra.mxu1 %v844_v35 }
  0x6b   :  { %765 = vmatprep.subr.bf16.mxu1 %v845_v36 }
  0x6e   :  { %766 = vmatpush3.bf16.msra.mxu1 %v846_v37 }
  0xcb   :  { %v1101_v19 = vpop.permute.xlu0 %171 }
  0xcc   :  { %v174_v20 = vsub.f32 %v84_v1, %v1101_v19 }
  0xce   :  { %v175_v21 = vpack.c.bf16 %v174_v20, %v174_v20  ;;  %v851_v20 = vld [vmem:[#allocation8 + $0x50] sm:$0xff]  }
  0xd0   :  { %300 = vmatmul.mubr.bf16.vlgmr.msra.gmra.mrb[0].mxu0 %v175_v21  ;;  %v852_v21 = vld [vmem:[#allocation8 + $0x10] sm:$0xff]  }
  0xd1   :  { %472 = vmatpush1.bf16.msra.mxu0 %v809_v3  ;;  %503 = vmatprep.mubr.bf16.mxu0 %v1006_v6 }
  0xd2   :  { %473 = vmatprep.subr.bf16.mxu0 %v810_v4 }
  0xd5   :  { %474 = vmatpush1.bf16.msra.mxu0 %v812_v5 }
  0xd6   :  { %475 = vmatprep.subr.bf16.mxu0 %v813_v7 }
  0xd9   :  { %476 = vmatpush1.bf16.msra.mxu0 %v815_v8  ;;  %v716_v8 = vld [vmem:[%s1141_s4] ss:$0 sm:$0xff] }
  0xda   :  { %477 = vmatprep.subr.bf16.mxu0 %v816_v9 }
  0xdd   :  { %478 = vmatpush1.bf16.msra.mxu0 %v818_v10 }
  0xde   :  { %479 = vmatprep.subr.bf16.mxu0 %v819_v11 }
  0xe1   :  { %480 = vmatpush1.bf16.msra.mxu0 %v821_v12 }
  0xe2   :  { %481 = vmatprep.subr.bf16.mxu0 %v822_v13 }
  0xe5   :  { %482 = vmatpush1.bf16.msra.mxu0 %v824_v14 }
  0xe6   :  { %483 = vmatprep.subr.bf16.mxu0 %v825_v15  ;;  %v847_v15 = vld [vmem:[#allocation8 + $0x40] sm:$0xff]  }
  0xe7   :  { %773 = vmatprep.subr.bf16.mxu1 %v847_v15 }
  0xe9   :  { %484 = vmatpush1.bf16.msra.mxu0 %v827_v16  ;;  %v848_v16 = vld [vmem:[#allocation8] sm:$0xff]  }
  0xea   :  { %485 = vmatprep.subr.bf16.mxu0 %v828_v17  ;;  %v849_v17 = vld [vmem:[#allocation8 + $0x48] sm:$0xff]  }
  0xed   :  { %486 = vmatpush1.bf16.msra.mxu0 %v830_v18  ;;  %v850_v18 = vld [vmem:[#allocation8 + $0x8] sm:$0xff]  }
 0x1a3   :  { %v301_v45 = vpop.f32.mrb[0].mxu0 }
 0x1a4   :  { %v302_v46 = vadd.f32 %v301_v45, %v1107_v43  ;;  %v303_v47 = vpop.f32.mrb[1].mxu0 }
 0x1a5   :  { %v304_v48 = vadd.f32 %v303_v47, %v1109_v44  ;;  %v305_v49 = vpop.f32.mrb[2].mxu0 }
 0x1a6   :  { %v308_v50 = vmin.f32 %v302_v46, 20.0  ;;  %v306_v51 = vpop.f32.mrb[3].mxu0 }
 0x1a7   :  { %v309_v52 = vmin.f32 %v304_v48, 20.0 }
 0x1a8   :  { %v310_v53 = vmul.f32 1.442695, %v308_v50 }
 0x1a9   :  { %v312_v54 = vmul.f32 1.442695, %v309_v52 }
 0x1aa   :  { %863 = vpow2.f32 %v310_v53 }
 0x1ab   :  { %865 = vpow2.f32 %v312_v54 }
 0x1b4   :  { %v864_v55 = vpop.eup %863 }
 0x1b5   :  { %v866_v56 = vpop.eup %865  ;;  %v314_v57 = vadd.f32 2.0, %v864_v55 }
 0x1b6   :  { %v315_v58 = vadd.f32 2.0, %v866_v56 }
 0x1b7   :  { %v316_v59 = vmul.f32 %v864_v55, %v314_v57 }
 0x1b8   :  { %v317_v60 = vmul.f32 %v866_v56, %v315_v58 }
 0x1b9   :  { %v320_v61 = vadd.f32 2.0, %v316_v59  ;;  %v318_v63 = vmul.f32 %v316_v59, %v302_v46  ;;  %v750_v59 = vld [vmem:[%s1144_s7] ss:$0 sm:$0xff] }
 0x1ba   :  { %v321_v62 = vadd.f32 2.0, %v317_v60  ;;  %v319_v1 = vmul.f32 %v317_v60, %v304_v48  ;;  %v733_v60 = vld [vmem:[%s1143_s6] ss:$0 sm:$0xff] }
 0x1bb   :  { %867 = vrcp.f32 %v320_v61 }
 0x1bc   :  { %869 = vrcp.f32 %v321_v62 }
 0x1c5   :  { %v868_v0 = vpop.eup %867 }
 0x1c6   :  { %v870_v2 = vpop.eup %869  ;;  %v324_v3 = vmul.f32 %v868_v0, %v318_v63 }
 0x1c7   :  { %v325_v4 = vmul.f32 %v870_v2, %v319_v1  ;;  %v680_v1 = vmul.f32 %v750_v59, %v1101_v19 }
 0x1c8   :  { %v326_v6 = vpack.c.bf16 %v324_v3, %v324_v3 }
 0x1c9   :  { %v327_v5 = vpack.c.bf16 %v325_v4, %v325_v4 }
 0x1cb   :  { %462 = vmatprep.mubr.bf16.mxu1 %v327_v5 }
 0x1cc   :  { %463 = vmatmul.mubr.bf16.vlgmr.msra.gmra.mrb[0].mxu1 %v326_v6 }
 0x1cd   :  { %774 = vmatpush3.bf16.msra.mxu1 %v848_v16 }
 0x1ce   :  { %775 = vmatprep.subr.bf16.mxu1 %v849_v17 }
 0x1d1   :  { %776 = vmatpush3.bf16.msra.mxu1 %v850_v18 }
 0x1d2   :  { %777 = vmatprep.subr.bf16.mxu1 %v851_v20 }
 0x1d5   :  { %778 = vmatpush3.bf16.msra.mxu1 %v852_v21 }
 0x1d6   :  { %779 = vmatprep.subr.bf16.mxu1 %v853_v22 }
 0x1d9   :  { %780 = vmatpush3.bf16.msra.mxu1 %v854_v23 }
 0x1da   :  { %781 = vmatprep.subr.bf16.mxu1 %v855_v24 }
 0x1dd   :  { %782 = vmatpush3.bf16.msra.mxu1 %v856_v25 }
 0x1de   :  { %783 = vmatprep.subr.bf16.mxu1 %v857_v26 }
 0x1e1   :  { %784 = vmatpush3.bf16.msra.mxu1 %v858_v27 }
 0x1e2   :  { %785 = vmatprep.subr.bf16.mxu1 %v859_v28 }
 0x1e5   :  { %786 = vmatpush3.bf16.msra.mxu1 %v860_v29 }
 0x1e6   :  { %787 = vmatprep.subr.bf16.mxu1 %v861_v30 }
 0x1e9   :  { %788 = vmatpush3.bf16.msra.mxu1 %v862_v31 }
 0x29f   :  { %v767_v7 = vpop.f32.mrb[0].mxu1 }
 0x2a0   :  { %v768_v9 = vpop.f32.mrb[1].mxu1 }
 0x2a1   :  { %v769_v10 = vadd.f32 %v768_v9, %v767_v7  ;;  %v770_v11 = vpop.f32.mrb[2].mxu1 }
 0x2a2   :  { %v771_v12 = vpop.f32.mrb[3].mxu1 }
 0x2a3   :  { %v465_v13 = vadd.f32 %v769_v10, %v716_v8 }
 0x2a5   :  { %v470_v14 = vpack.c.bf16 %v465_v13, %v465_v13 }
 0x2a7   :  { %504 = vmatmul.mubr.bf16.vlgmr.msra.gmra.mrb[4].mxu0 %v470_v14 }
 0x37a   :  { %v505_v32 = vpop.f32.mrb[4].mxu0 }
 0x37b   :  { %v506_v33 = vadd.f32 %v505_v32, %v1107_v43  ;;  %v507_v34 = vpop.f32.mrb[5].mxu0 }
 0x37c   :  { %v508_v35 = vadd.f32 %v507_v34, %v1109_v44  ;;  %v509_v36 = vpop.f32.mrb[6].mxu0 }
 0x37d   :  { %v512_v37 = vmin.f32 %v506_v33, 20.0  ;;  %v510_v38 = vpop.f32.mrb[7].mxu0 }
 0x37e   :  { %v513_v39 = vmin.f32 %v508_v35, 20.0 }
 0x37f   :  { %v514_v40 = vmul.f32 1.442695, %v512_v37 }
 0x380   :  { %v516_v41 = vmul.f32 1.442695, %v513_v39 }
 0x381   :  { %871 = vpow2.f32 %v514_v40 }
 0x382   :  { %873 = vpow2.f32 %v516_v41 }
 0x38b   :  { %v872_v42 = vpop.eup %871 }
 0x38c   :  { %v874_v45 = vpop.eup %873  ;;  %v518_v46 = vadd.f32 2.0, %v872_v42 }
 0x38d   :  { %v519_v47 = vadd.f32 2.0, %v874_v45 }
 0x38e   :  { %v520_v48 = vmul.f32 %v872_v42, %v518_v46 }
 0x38f   :  { %v521_v49 = vmul.f32 %v874_v45, %v519_v47 }
 0x390   :  { %v524_v50 = vadd.f32 2.0, %v520_v48  ;;  %v522_v43 = vmul.f32 %v520_v48, %v506_v33 }
 0x391   :  { %v525_v51 = vadd.f32 2.0, %v521_v49  ;;  %v523_v52 = vmul.f32 %v521_v49, %v508_v35 }
 0x392   :  { %875 = vrcp.f32 %v524_v50 }
 0x393   :  { %877 = vrcp.f32 %v525_v51 }
 0x39c   :  { %v876_v44 = vpop.eup %875 }
 0x39d   :  { %v878_v53 = vpop.eup %877  ;;  %v528_v54 = vmul.f32 %v876_v44, %v522_v43 }
 0x39e   :  { %v529_v55 = vmul.f32 %v878_v53, %v523_v52 }
 0x39f   :  { %v530_v57 = vpack.c.bf16 %v528_v54, %v528_v54 }
 0x3a0   :  { %v531_v56 = vpack.c.bf16 %v529_v55, %v529_v55 }
 0x3a2   :  { %666 = vmatprep.mubr.bf16.mxu1 %v531_v56 }
 0x3a3   :  { %667 = vmatmul.mubr.bf16.vlgmr.msra.gmra.mrb[4].mxu1 %v530_v57 }
 0x476   :  { %v789_v58 = vpop.f32.mrb[4].mxu1 }
 0x477   :  { %v790_v61 = vpop.f32.mrb[5].mxu1 }
 0x478   :  { %v791_v62 = vadd.f32 %v790_v61, %v789_v58  ;;  %v792_v63 = vpop.f32.mrb[6].mxu1 }
 0x479   :  { %v793_v0 = vpop.f32.mrb[7].mxu1 }
 0x47a   :  { %v669_v2 = vadd.f32 %v791_v62, %v733_v60 }
 0x47c   :  { %v681_v3 = vadd.f32 %v680_v1, %v669_v2 }
 0x47e   :  { %682 = vst [vmem:[#allocation10] sm:$0xff] %v681_v3 }
 0x47f   :  { %978 = shalt.err (!%p975_p8)
}
 0x480   :  { %s979_s17 = scalar_lea.hbm %s1145_s8, 128 }
 0x481   :  { %p980_p9 = scmp.ne.s32.totalorder %s1145_s8, %s979_s17  ;;  %p983_p10 = scmp.lt.u32.totalorder %s979_s17, %s1145_s8 }
 0x483   :  { %p985_p11 = pnand %p983_p10, %p980_p9 }
 0x485   :  { %988 = shalt.err (!%p985_p11)
}
 0x486   :  { %692 = dma.vmem_to_hbm [thread:$0]  %s690_s15, 128, %s1145_s8, [#allocation4]  }
 0x487   :  { %995 = dma.done.wait [#allocation4], 128  }
 0x488   :  { %996 = vsyncadd [#allocation4], 4294967168 }
 0x489   :  { %696 = vsyncpa [#allocation3], 1 }
 0x48a   :  { %697 = vsyncpa [#allocation6], 1 }
 0x48b   :  { %698 = vsyncpa [#allocation9], 1 }
 0x48c   :  { %699 = vsyncpa [#allocation4], 1 }

</bundles_post_ra>
